<compile_context>
chip_gen: v7x
topology: tpu7x:2x2x1
jax: 0.10.0
libtpu: 0.0.40
codegen_flags: <defaults>
</compile_context>

<pallas_src>
import functools
import math

import jax
import jax.numpy as jnp
from jax.experimental import pallas as pl
from jax.experimental.pallas import tpu as pltpu


def _softplus(z):
    # PyTorch nn.Softplus(beta=1, threshold=20):
    #   z                 if z > 20
    #   log(1 + exp(z))   otherwise   (min() guards exp overflow)
    return jnp.where(z > 20.0, z, jnp.log1p(jnp.exp(jnp.minimum(z, 20.0))))


# ---------------------------------------------------------------------------
# Small path: whole problem as one block (no K loop).
# ---------------------------------------------------------------------------
def _lnp_small_kernel(x_ref, w_ref, b_ref, o_ref):
    # x_ref: (B, D)  w_ref: (O, D)  b_ref: (1, O)  o_ref: (B, O)
    z = jax.lax.dot_general(
        x_ref[...], w_ref[...],
        dimension_numbers=(((1,), (1,)), ((), ())),   # contract D with D
        preferred_element_type=jnp.float32)
    z = z + b_ref[...]
    o_ref[...] = _softplus(z).astype(o_ref.dtype)


# ---------------------------------------------------------------------------
# Tiled path: grid = (M/tm, O/tn, D/tk), f32 accumulator, epilogue on last k.
# ---------------------------------------------------------------------------
def _lnp_tiled_kernel(x_ref, w_ref, b_ref, o_ref, acc_ref, *, cast_bf16):
    # x_ref: (tm, tk)  w_ref: (tn, tk)  b_ref: (1, tn)  o_ref: (tm, tn)
    k = pl.program_id(2)

    @pl.when(k == 0)
    def _():
        acc_ref[...] = jnp.zeros_like(acc_ref)

    a = x_ref[...]
    w = w_ref[...]
    if cast_bf16:  # compile-time flag: bf16 MXU rate, f32 accumulate
        a = a.astype(jnp.bfloat16)
        w = w.astype(jnp.bfloat16)

    acc_ref[...] += jax.lax.dot_general(
        a, w,
        dimension_numbers=(((1,), (1,)), ((), ())),   # contract K with K
        preferred_element_type=jnp.float32)

    @pl.when(k == pl.num_programs(2) - 1)
    def _():
        z = acc_ref[...] + b_ref[...]
        o_ref[...] = _softplus(z).astype(o_ref.dtype)


def _round_up(a, m):
    return (a + m - 1) // m * m


def linear_nonlinear(x, weight, bias, *, tm=256, tn=256, tk=512,
                     use_bf16=False, force_tiled=False,
                     small_path_bytes=6 * 1024 * 1024):
    """x: (B, ...) f32; weight: (O, D) f32 (PyTorch layout); bias: (O,) f32.

    D = prod(x.shape[1:]) must equal weight.shape[1].
    """
    B = x.shape[0]
    D = math.prod(x.shape[1:])
    O = weight.shape[0]
    x_flat = x.reshape(B, D)
    b2d = bias.reshape(1, O)

    total_bytes = 4 * (B * D + O * D + B * O + O)
    if not force_tiled and total_bytes <= small_path_bytes:
        # Single-block fast path: everything fits in VMEM; tiling would only
        # add per-step overhead at this size.
        return pl.pallas_call(
            _lnp_small_kernel,
            out_shape=jax.ShapeDtypeStruct((B, O), jnp.float32),
            grid_spec=pltpu.PrefetchScalarGridSpec(
                num_scalar_prefetch=0,
                grid=(1,),
                in_specs=[
                    pl.BlockSpec((B, D), lambda i: (0, 0)),
                    pl.BlockSpec((O, D), lambda i: (0, 0)),
                    pl.BlockSpec((1, O), lambda i: (0, 0)),
                ],
                out_specs=pl.BlockSpec((B, O), lambda i: (0, 0)),
            ),
            compiler_params=pltpu.CompilerParams(
                dimension_semantics=("arbitrary",)),
        )(x_flat, weight, b2d)

    # Tiled path. Pad to tile multiples (K pads with zeros -> no effect on
    # the contraction; padded M/N rows/cols are sliced off afterwards).
    Bp, Op, Dp = _round_up(B, tm), _round_up(O, tn), _round_up(D, tk)
    x_p = x_flat if (Bp == B and Dp == D) else jnp.pad(
        x_flat, ((0, Bp - B), (0, Dp - D)))
    w_p = weight if (Op == O and Dp == D) else jnp.pad(
        weight, ((0, Op - O), (0, Dp - D)))
    b_p = b2d if Op == O else jnp.pad(b2d, ((0, 0), (0, Op - O)))

    kernel = functools.partial(_lnp_tiled_kernel, cast_bf16=use_bf16)

    out_p = pl.pallas_call(
        kernel,
        out_shape=jax.ShapeDtypeStruct((Bp, Op), jnp.float32),
        grid_spec=pltpu.PrefetchScalarGridSpec(
            num_scalar_prefetch=0,
            grid=(Bp // tm, Op // tn, Dp // tk),
            in_specs=[
                pl.BlockSpec((tm, tk), lambda i, j, k: (i, k)),   # x
                pl.BlockSpec((tn, tk), lambda i, j, k: (j, k)),   # W (O, D)
                pl.BlockSpec((1, tn), lambda i, j, k: (0, j)),    # bias
            ],
            out_specs=pl.BlockSpec((tm, tn), lambda i, j, k: (i, j)),
            scratch_shapes=[pltpu.VMEM((tm, tn), jnp.float32)],
        ),
        compiler_params=pltpu.CompilerParams(
            dimension_semantics=("parallel", "parallel", "arbitrary")),
    )(x_p, w_p, b_p)

    if Bp == B and Op == O:
        return out_p
    return out_p[:B, :O]


def _reference(x, weight, bias):
    B = x.shape[0]
    z = x.reshape(B, -1) @ weight.T + bias
    return _softplus(z)


if __name__ == "__main__":
    key = jax.random.PRNGKey(0)

    # ------------------------------------------------------------------
    # 1) Module's toy shape: input_shape=(16,16) -> D=256, output_size=32.
    #    (small single-block path)
    # ------------------------------------------------------------------
    B, H, W, O = 2, 16, 16, 32
    D = H * W
    kx, kw, kb, k2 = jax.random.split(key, 4)

    x = jax.random.normal(kx, (B, H, W), dtype=jnp.float32)
    bound = 1.0 / jnp.sqrt(jnp.float32(D))
    weight = jax.random.uniform(kw, (O, D), dtype=jnp.float32,
                                minval=-bound, maxval=bound)
    bias = jax.random.uniform(kb, (O,), dtype=jnp.float32,
                              minval=-bound, maxval=bound)

    out = linear_nonlinear(x, weight, bias)
    jax.block_until_ready(out)
    ref = _reference(x, weight, bias)
    assert out.shape == (B, O)
    assert jnp.allclose(out, ref, atol=1e-5, rtol=1e-5)

    # ------------------------------------------------------------------
    # 2) Tiled path (forced), non-tile-aligned shapes to exercise padding,
    #    K loop (3 steps), and the bias/softplus epilogue.
    # ------------------------------------------------------------------
    B2, H2, W2, O2 = 200, 32, 40, 300     # D2 = 1280
    D2 = H2 * W2
    kx2, kw2, kb2 = jax.random.split(k2, 3)

    x2 = jax.random.normal(kx2, (B2, H2, W2), dtype=jnp.float32)
    bound2 = 1.0 / jnp.sqrt(jnp.float32(D2))
    weight2 = jax.random.uniform(kw2, (O2, D2), dtype=jnp.float32,
                                 minval=-bound2, maxval=bound2)
    bias2 = jax.random.uniform(kb2, (O2,), dtype=jnp.float32,
                               minval=-bound2, maxval=bound2)

    out2 = linear_nonlinear(x2, weight2, bias2, force_tiled=True)
    jax.block_until_ready(out2)
    ref2 = _reference(x2, weight2, bias2)
    assert out2.shape == (B2, O2)
    assert jnp.allclose(out2, ref2, atol=2e-3, rtol=2e-3)

    # Optional bf16-operand variant (f32 accumulate) — looser tolerance.
    out2_bf16 = linear_nonlinear(x2, weight2, bias2, force_tiled=True,
                                 use_bf16=True)
    jax.block_until_ready(out2_bf16)
    assert jnp.allclose(out2_bf16, ref2, atol=5e-2, rtol=5e-2)

    print("KERNEL_OK")
</pallas_src>

<mosaic_0001>
module attributes {stable_mosaic.version = 11 : i64} {
  func.func @_lnp_small_kernel(%arg0: i32, %arg1: memref<2x256xf32, #tpu.memory_space<vmem>>, %arg2: memref<32x256xf32, #tpu.memory_space<vmem>>, %arg3: memref<1x32xf32, #tpu.memory_space<vmem>>, %arg4: memref<2x32xf32, #tpu.memory_space<vmem>>) attributes {dimension_semantics = [#tpu.dimension_semantics<arbitrary>], iteration_bounds = array<i64: 1>, scalar_prefetch = 0 : i64, scratch_operands = 0 : i64, tpu.core_type = #tpu.core_type<tc>, window_params = [{pipeline_mode = #tpu.pipeline_mode<synchronous>, transform_indices = @transform_0, window_bounds = array<i64: 2, 256>}, {pipeline_mode = #tpu.pipeline_mode<synchronous>, transform_indices = @transform_1, window_bounds = array<i64: 32, 256>}, {pipeline_mode = #tpu.pipeline_mode<synchronous>, transform_indices = @transform_2, window_bounds = array<i64: 1, 32>}, {pipeline_mode = #tpu.pipeline_mode<synchronous>, transform_indices = @transform_3, window_bounds = array<i64: 2, 32>}]} {
    %c0 = arith.constant 0 : index
    %c0_0 = arith.constant 0 : index
    %0 = vector.load %arg1[%c0, %c0_0] : memref<2x256xf32, #tpu.memory_space<vmem>>, vector<2x256xf32>
    %c0_1 = arith.constant 0 : index
    %c0_2 = arith.constant 0 : index
    %1 = vector.load %arg2[%c0_1, %c0_2] : memref<32x256xf32, #tpu.memory_space<vmem>>, vector<32x256xf32>
    %cst = arith.constant dense<0.000000e+00> : vector<2x32xf32>
    %2 = tpu.matmul %0, %1, %cst {dimension_numbers = #tpu.dot_dimension_numbers<[1], [1], [0], [0], [0, 0, 1, 0], [], []>} : vector<2x256xf32>, vector<32x256xf32>, vector<2x32xf32> -> vector<2x32xf32>
    %c0_3 = arith.constant 0 : index
    %c0_4 = arith.constant 0 : index
    %3 = vector.load %arg3[%c0_3, %c0_4] : memref<1x32xf32, #tpu.memory_space<vmem>>, vector<1x32xf32>
    %4 = vector.broadcast %3 : vector<1x32xf32> to vector<2x32xf32>
    %5 = arith.addf %2, %4 : vector<2x32xf32>
    %cst_5 = arith.constant 2.000000e+01 : f32
    %6 = vector.broadcast %cst_5 : f32 to vector<2x32xf32>
    %7 = arith.cmpf ogt, %5, %6 : vector<2x32xf32>
    %cst_6 = arith.constant 2.000000e+01 : f32
    %8 = vector.broadcast %cst_6 : f32 to vector<2x32xf32>
    %9 = arith.minimumf %5, %8 : vector<2x32xf32>
    %10 = math.exp %9 : vector<2x32xf32>
    %11 = math.log1p %10 : vector<2x32xf32>
    %12 = arith.select %7, %5, %11 : vector<2x32xi1>, vector<2x32xf32>
    %c0_7 = arith.constant 0 : index
    %c0_8 = arith.constant 0 : index
    %13 = vector.load %arg4[%c0_7, %c0_8] : memref<2x32xf32, #tpu.memory_space<vmem>>, vector<2x32xf32>
    tpu.vector_store %arg4[%c0_7, %c0_8], %12 {strides = array<i32>} : memref<2x32xf32, #tpu.memory_space<vmem>>, vector<2x32xf32>,
    return
  }
  func.func @transform_0(%arg0: i32) -> (i32, i32) {
    %c0_i32 = arith.constant 0 : i32
    %c0_i32_0 = arith.constant 0 : i32
    %c0_i32_1 = arith.constant 0 : i32
    return %c0_i32, %c0_i32_0 : i32, i32
  }
  func.func @transform_1(%arg0: i32) -> (i32, i32) {
    %c0_i32 = arith.constant 0 : i32
    %c0_i32_0 = arith.constant 0 : i32
    %c0_i32_1 = arith.constant 0 : i32
    return %c0_i32, %c0_i32_0 : i32, i32
  }
  func.func @transform_2(%arg0: i32) -> (i32, i32) {
    %c0_i32 = arith.constant 0 : i32
    %c0_i32_0 = arith.constant 0 : i32
    %c0_i32_1 = arith.constant 0 : i32
    return %c0_i32, %c0_i32_0 : i32, i32
  }
  func.func @transform_3(%arg0: i32) -> (i32, i32) {
    %c0_i32 = arith.constant 0 : i32
    %c0_i32_0 = arith.constant 0 : i32
    %c0_i32_1 = arith.constant 0 : i32
    return %c0_i32, %c0_i32_0 : i32, i32
  }
}

</mosaic_0001>

<bundles_post_ra>
// kernel: tpu_custom_call.1
= control target key start
LH: loop header
LB: loop body
LE: loop exit
PB: predicated region body
PF: predicated region fallthrough
CT: control target
= control target key end

     0   :  { %8 = vsyncpa [#allocation3], 0  ;;  %s332_s0 = inlined_call_operand.hbm [shape: f32[2,256], index: 0, kind: input, shape index: {}]   ;;  %s333_s1 = inlined_call_operand.hbm [shape: f32[32,256], index: 1, kind: input, shape index: {}]   ;;  %s334_s2 = inlined_call_operand.vmem [shape: f32[1,32], index: 2, kind: input, shape index: {}]   ;;  %s335_s3 = inlined_call_operand.hbm [shape: f32[2,32], index: 3, kind: output, shape index: {}]  }
   0x1   :  { %9 = vsyncpa [#allocation6], 0 }
   0x2   :  { %10 = vsyncpa [#allocation4], 0  ;;  %s261_s12 = smov [#allocation2]   ;;  %s262_s14 = smov [#allocation5]  }
   0x3   :  { %s17_s13 = sshll.u32 %s261_s12, 4  ;;  %s26_s15 = sshll.u32 %s262_s14, 4  ;;  %s18_s13 = int_to_ptr.vmem [resolvable:$true] %s17_s13  ;;  %s286_s15 = int_to_ptr.vmem [resolvable:$true] %s26_s15 }
   0x4   :  { %s189_s18 = scalar_lea.hbm %s332_s0, 64 }
   0x5   :  { %p190_p0 = scmp.ne.s32.totalorder %s332_s0, %s189_s18  ;;  %p193_p1 = scmp.lt.u32.totalorder %s189_s18, %s332_s0 }
   0x7   :  { %p195_p2 = pnand %p193_p1, %p190_p0 }
   0x9   :  { %198 = shalt.err (!%p195_p2)
}
   0xa   :  { %s199_s23 = scalar_lea.vmem %s18_s13, 64  ;;  %p204_p4 = scmp.lt.s32.totalorder %s18_s13, %s18_s13 }
   0xb   :  { %p200_p3 = scmp.ne.s32.totalorder %s18_s13, %s199_s23  ;;  %p205_p5 = scmp.lt.s32.totalorder %s199_s23, %s199_s23 }
   0xd   :  { %p206_p6 = por %p205_p5, %p204_p4 }
   0xf   :  { %p207_p7 = pnand %p206_p6, %p200_p3 }
  0x11   :  { %210 = shalt.err (!%p207_p7)
}
  0x12   :  { %20 = dma.hbm_to_vmem [thread:$0]  %s332_s0, 64, %s18_s13, [#allocation3]  }
  0x13   :  { %s211_s28 = scalar_lea.hbm %s333_s1, 1024 }
  0x14   :  { %p212_p8 = scmp.ne.s32.totalorder %s333_s1, %s211_s28  ;;  %p215_p9 = scmp.lt.u32.totalorder %s211_s28, %s333_s1 }
  0x16   :  { %p217_p10 = pnand %p215_p9, %p212_p8 }
  0x18   :  { %220 = shalt.err (!%p217_p10)
}
  0x19   :  { %s221_s6 = scalar_lea.vmem %s286_s15, 1024  ;;  %p226_p12 = scmp.lt.s32.totalorder %s286_s15, %s286_s15 }
  0x1a   :  { %p222_p11 = scmp.ne.s32.totalorder %s286_s15, %s221_s6  ;;  %p227_p13 = scmp.lt.s32.totalorder %s221_s6, %s221_s6 }
  0x1c   :  { %p228_p0 = por %p227_p13, %p226_p12 }
  0x1e   :  { %p229_p1 = pnand %p228_p0, %p222_p11 }
  0x20   :  { %232 = shalt.err (!%p229_p1)
}
  0x21   :  { %s263_s0 = smov 256   ;;  %s264_s7 = smov 16  }
  0x22   :  { %32 = dma.hbm_to_vmem [thread:$0]  %s333_s1, 1024, %s286_s15, [#allocation6], %s263_s0, %s263_s0, %s264_s7  }
  0x23   :  { %255 = dma.done.wait [#allocation3], 64  }
  0x24   :  { %256 = vsyncadd [#allocation3], 4294967232 }
  0x25   :  { %257 = dma.done.wait [#allocation6], 1024  }
  0x26   :  { %258 = vsyncadd [#allocation6], 4294966272  ;;  %v43_v0 = vld [vmem:[#allocation5 + $0x8] sm:$0xff]  ;;  %v45_v1 = vld [vmem:[#allocation5 + $0x18] sm:$0xff]  ;;  %s265_s11 = smov [#allocation7]   ;;  %vm152_vm1 = vcmask 254976  }
  0x27   :  { %v42_v2 = vld [vmem:[#allocation5] sm:$0xff]  ;;  %v172_v3 = vpack.c.bf16 %v45_v1, %v43_v0  ;;  %v44_v4 = vld [vmem:[#allocation5 + $0x10] sm:$0xff]  ;;  %v47_v5 = vld [vmem:[#allocation5 + $0x28] sm:$0xff]  ;;  %s160_s12 = sshll.u32 %s265_s11, 4  ;;  %s161_s12 = int_to_ptr.vmem [resolvable:$true] %s160_s12 }
  0x28   :  { %v49_v6 = vld [vmem:[#allocation5 + $0x38] sm:$0xff]  ;;  %v174_v7 = vpack.c.bf16 %v44_v4, %v42_v2  ;;  %v46_v11 = vld [vmem:[#allocation5 + $0x20] sm:$0xff]  ;;  %v48_v12 = vld [vmem:[#allocation5 + $0x30] sm:$0xff]  ;;  %p238_p3 = scmp.lt.s32.totalorder %s161_s12, %s161_s12 }
  0x29   :  { %v176_v8 = vpack.c.bf16 %v49_v6, %v47_v5  ;;  %v171_v9 = vld.sshfl [vmem:[#allocation2] sm:$0x33 pattern:$0x76325410]  ;;  %173 = vmatprep.subr.bf16.mxu0 %v172_v3  ;;  %v178_v13 = vpack.c.bf16 %v48_v12, %v46_v11 }
  0x2a   :  { %v65_v10 = vcombine.high %v171_v9, %v171_v9  ;;  %175 = vmatpush1.bf16.xpose.msra.mxu0 %v174_v7  ;;  %v170_v14 = vld [vmem:[%s334_s2] ss:$0 sm:$0xff]  ;;  %s233_s2 = scalar_lea.vmem %s161_s12, 32 }
  0x2b   :  { %177 = vmatprep.subr.bf16.mxu0 %v176_v8  ;;  %p234_p2 = scmp.ne.s32.totalorder %s161_s12, %s233_s2  ;;  %p239_p4 = scmp.lt.s32.totalorder %s233_s2, %s233_s2 }
  0x2c   :  { %132 = vmatprep.mubr.f32.mxu0 %v65_v10 }
  0x2d   :  { %p240_p5 = por %p239_p4, %p238_p3 }
  0x2f   :  { %p241_p6 = pnand %p240_p5, %p234_p2 }
  0x32   :  { %179 = vmatpush1.bf16.xpose.msra.mxu0 %v178_v13 }
  0x39   :  { %133 = vmatmul.mubr.f32.vlgmr.msra.gmra.mrb[0].mxu0 %v171_v9 }
 0x10c   :  { %v134_v15 = vpop.f32.mrb[0].mxu0 }
 0x10d   :  { %v135_v16 = vadd.f32 %v170_v14, %v134_v15  ;;  %v136_v17 = vpop.f32.mrb[1].mxu0 }
 0x10f   :  { %v139_v18 = vmin.f32 %v135_v16, 20.0  ;;  %vm138_vm2 = vcmp.gt.f32.partialorder %v135_v16, 20.0 }
 0x111   :  { %v140_v19 = vmul.f32 1.442695, %v139_v18 }
 0x113   :  { %185 = vpow2.f32 %v140_v19 }
 0x11d   :  { %v186_v20 = vpop.eup %185 }
 0x11e   :  { %v142_v21 = vadd.f32 1.0, %v186_v20  ;;  %v145_v22 = vmul.f32 -0.5, %v186_v20  ;;  %v148_v24 = vand.u32 2147483647, %v186_v20 }
 0x120   :  { %187 = vlog2.f32 %v142_v21  ;;  %v146_v23 = vadd.f32 1.0, %v145_v22  ;;  %vm149_vm0 = vcmp.lt.f32.partialorder %v148_v24, 0.0004427343 }
 0x122   :  { %v147_v27 = vmul.f32 %v186_v20, %v146_v23 }
 0x12a   :  { %v188_v25 = vpop.eup %187 }
 0x12b   :  { %v144_v26 = vmul.f32 0.6931472, %v188_v25 }
 0x12d   :  { %v150_v28 = vsel %vm149_vm0, %v147_v27, %v144_v26 }
 0x12e   :  { %v151_v29 = vsel %vm138_vm2, %v135_v16, %v150_v28 }
 0x12f   :  { %153 = vst.msk [vmem:[#allocation7] sm:$0x3] %vm152_vm1, %v151_v29 }
 0x130   :  { %244 = shalt.err (!%p241_p6)
}
 0x131   :  { %s245_s15 = scalar_lea.hbm %s335_s3, 32 }
 0x132   :  { %p246_p7 = scmp.ne.s32.totalorder %s335_s3, %s245_s15  ;;  %p249_p8 = scmp.lt.u32.totalorder %s245_s15, %s335_s3 }
 0x134   :  { %p251_p9 = pnand %p249_p8, %p246_p7 }
 0x136   :  { %254 = shalt.err (!%p251_p9)
}
 0x137   :  { %163 = dma.vmem_to_hbm [thread:$0]  %s161_s12, 32, %s335_s3, [#allocation4]  }
 0x138   :  { %259 = dma.done.wait [#allocation4], 32  }
 0x139   :  { %260 = vsyncadd [#allocation4], 4294967264 }
 0x13a   :  { %167 = vsyncpa [#allocation3], 1 }
 0x13b   :  { %168 = vsyncpa [#allocation6], 1 }
 0x13c   :  { %169 = vsyncpa [#allocation4], 1 }

</bundles_post_ra>
